<compile_context>
chip_gen: v7x
topology: tpu7x:2x2x1
jax: 0.10.0
libtpu: 0.0.40
codegen_flags: <defaults>
</compile_context>

<pallas_src>
import functools

import jax
import jax.numpy as jnp
from jax.experimental import pallas as pl
from jax.experimental.pallas import tpu as pltpu

NUM_BLOCKS = 2
INPUT_DIM = 32
HIDDEN_DIM = 64
OUTPUT_DIM = 16
LN_EPS = 1e-5            # torch.nn.LayerNorm default
DEFAULT_TILE_B = 1024    # batch rows per grid step (sweepable; fits v5e scoped VMEM)


def _round_up(n, m):
    return ((n + m - 1) // m) * m


def _silu(h):
    # silu(h) = h * sigmoid(h) = 0.5 * h * (1 + tanh(h / 2)): one EUP op (tanh)
    # instead of exp + divide.
    return 0.5 * h * (1.0 + jnp.tanh(0.5 * h))


def _layernorm(h, gamma, beta):
    # True-width PyTorch LayerNorm (biased variance, eps inside rsqrt). No lane
    # mask needed: every feature dim is at its real size.
    mu = jnp.mean(h, axis=-1, keepdims=True)
    diff = h - mu
    var = jnp.mean(diff * diff, axis=-1, keepdims=True)
    return diff * jax.lax.rsqrt(var + LN_EPS) * gamma + beta


def _mm(a, w, mxu_dtype):
    return jnp.dot(a.astype(mxu_dtype), w.astype(mxu_dtype),
                   preferred_element_type=jnp.float32)


def mlp_resnet_kernel(x_ref, ln1_ref, w1_ref, hvecs_ref, blk_w_ref, w2_ref, b2_ref,
                      out_ref, *, num_blocks, mxu_dtype):
    # ln1 rows:   0 ln1_gamma, 1 ln1_beta                              (2, 32)
    # hvecs rows: 0 b1, 1 ln2_gamma, 2 ln2_beta,
    #             3+3i blk_ln_gamma[i], 4+3i blk_ln_beta[i], 5+3i blk_b[i]  (3+3NB, 64)
    x = x_ref[...]                                                   # (tb, 32) f32

    # layer_norm1 -> fc1 -> SiLU
    h = _layernorm(x, ln1_ref[0:1, :], ln1_ref[1:2, :])
    h = _mm(h, w1_ref[...], mxu_dtype) + hvecs_ref[0:1, :]           # (tb, 64)
    h = _silu(h)

    # residual MLP blocks (num_blocks is a Python constant -> fully unrolled,
    # lets the LLO scheduler interleave MXU pushes with VPU/EUP work)
    for i in range(num_blocks):
        identity = h
        base = 3 + 3 * i
        t = _layernorm(h, hvecs_ref[base:base + 1, :],
                       hvecs_ref[base + 1:base + 2, :])
        t = _mm(t, blk_w_ref[i], mxu_dtype) + hvecs_ref[base + 2:base + 3, :]
        h = _silu(t) + identity

    # layer_norm2 -> fc2 (true 16-wide output store: 8x less writeback traffic)
    h = _layernorm(h, hvecs_ref[1:2, :], hvecs_ref[2:3, :])
    out_ref[...] = _mm(h, w2_ref[...], mxu_dtype) + b2_ref[...]


def pack_params(p):
    """Pack params at their TRUE widths: (2,32) LN1 vecs, one (3+3NB,64) array of
    hidden-width vectors, plus w1 / stacked block weights / w2 / fc2 bias."""
    num_blocks = p["blk_w"].shape[0]
    ln1 = jnp.concatenate([p["ln1_g"], p["ln1_b"]], axis=0)           # (2, 32)
    rows = [p["b1"], p["ln2_g"], p["ln2_b"]]
    for i in range(num_blocks):
        rows += [p["blk_ln_g"][i], p["blk_ln_b"][i], p["blk_b"][i]]
    hvecs = jnp.concatenate(rows, axis=0)                             # (3+3NB, 64)
    return ln1, p["w1"], hvecs, p["blk_w"], p["w2"], p["b2"], num_blocks


def mlp_resnet_forward(x, params, *, tile_b=DEFAULT_TILE_B, mxu_bf16=False):
    batch, in_dim = x.shape
    ln1, w1, hvecs, blk_w, w2, b2, num_blocks = pack_params(params)
    hidden_dim = w1.shape[1]
    out_dim = w2.shape[1]

    # Pad the batch only to a sublane multiple (8); the grid handles a partial
    # last tile (OOB reads are row-local garbage, OOB writes are dropped).
    batch_p = _round_up(batch, 8)
    if batch_p != batch:
        x = jnp.pad(x, ((0, batch_p - batch), (0, 0)))

    # Cap the tile so v7x's 2 TensorCores both get work once the batch is big
    # enough, never exceeding the (sublane-padded) batch.
    tb = min(tile_b, batch_p, max(8, _round_up(pl.cdiv(batch_p, 2), 8)))
    grid = (pl.cdiv(batch_p, tb),)

    kernel = functools.partial(
        mlp_resnet_kernel, num_blocks=num_blocks,
        mxu_dtype=jnp.bfloat16 if mxu_bf16 else jnp.float32)

    param_bytes = 4 * sum(int(a.size) for a in (ln1, w1, hvecs, blk_w, w2, b2))
    cost = pl.CostEstimate(
        flops=2 * batch_p * (in_dim * hidden_dim
                             + num_blocks * hidden_dim * hidden_dim
                             + hidden_dim * out_dim),
        transcendentals=batch_p * (num_blocks + 1) * hidden_dim,
        bytes_accessed=4 * (x.size + batch_p * out_dim) + param_bytes,
    )

    out = pl.pallas_call(
        kernel,
        out_shape=jax.ShapeDtypeStruct((batch_p, out_dim), jnp.float32),
        grid_spec=pltpu.PrefetchScalarGridSpec(
            num_scalar_prefetch=0,
            grid=grid,
            in_specs=[
                pl.BlockSpec((tb, in_dim), lambda i: (i, 0)),       # batch tile, pipelined
                pl.BlockSpec(ln1.shape, lambda i: (0, 0)),          # resident LN1 vecs
                pl.BlockSpec(w1.shape, lambda i: (0, 0)),           # resident fc1 weight
                pl.BlockSpec(hvecs.shape, lambda i: (0, 0)),        # resident hidden vecs
                pl.BlockSpec(blk_w.shape, lambda i: (0, 0, 0)),     # resident block weights
                pl.BlockSpec(w2.shape, lambda i: (0, 0)),           # resident fc2 weight
                pl.BlockSpec(b2.shape, lambda i: (0, 0)),           # resident fc2 bias
            ],
            out_specs=pl.BlockSpec((tb, out_dim), lambda i: (i, 0)),
        ),
        compiler_params=pltpu.CompilerParams(
            dimension_semantics=("parallel",)),
        cost_estimate=cost,
    )(x, ln1, w1, hvecs, blk_w, w2, b2)

    return out[:batch]


def make_params(key):
    ks = jax.random.split(key, 8)
    scale1 = 1.0 / jnp.sqrt(INPUT_DIM)
    scale_h = 1.0 / jnp.sqrt(HIDDEN_DIM)
    return {
        # layer_norm1
        "ln1_g": jnp.ones((1, INPUT_DIM), jnp.float32),
        "ln1_b": jnp.zeros((1, INPUT_DIM), jnp.float32),
        # fc1
        "w1": jax.random.uniform(ks[0], (INPUT_DIM, HIDDEN_DIM), jnp.float32,
                                 -scale1, scale1),
        "b1": jax.random.uniform(ks[1], (1, HIDDEN_DIM), jnp.float32,
                                 -scale1, scale1),
        # residual blocks: LayerNorm(dim) + Linear(dim, dim), stacked
        "blk_ln_g": jnp.ones((NUM_BLOCKS, 1, HIDDEN_DIM), jnp.float32),
        "blk_ln_b": jnp.zeros((NUM_BLOCKS, 1, HIDDEN_DIM), jnp.float32),
        "blk_w": jax.random.uniform(ks[2], (NUM_BLOCKS, HIDDEN_DIM, HIDDEN_DIM),
                                    jnp.float32, -scale_h, scale_h),
        "blk_b": jax.random.uniform(ks[3], (NUM_BLOCKS, 1, HIDDEN_DIM),
                                    jnp.float32, -scale_h, scale_h),
        # layer_norm2
        "ln2_g": jnp.ones((1, HIDDEN_DIM), jnp.float32),
        "ln2_b": jnp.zeros((1, HIDDEN_DIM), jnp.float32),
        # fc2
        "w2": jax.random.uniform(ks[4], (HIDDEN_DIM, OUTPUT_DIM), jnp.float32,
                                 -scale_h, scale_h),
        "b2": jax.random.uniform(ks[5], (1, OUTPUT_DIM), jnp.float32,
                                 -scale_h, scale_h),
    }


# --- pure-JAX reference (independent formulation: sigmoid-form SiLU) ---
def _layernorm_ref(h, gamma, beta):
    mu = jnp.mean(h, axis=-1, keepdims=True)
    var = jnp.mean((h - mu) * (h - mu), axis=-1, keepdims=True)
    return (h - mu) * jax.lax.rsqrt(var + LN_EPS) * gamma + beta


def reference_forward(x, p):
    def silu(h):
        return h * jax.nn.sigmoid(h)
    h = _layernorm_ref(x, p["ln1_g"], p["ln1_b"])
    h = silu(h @ p["w1"] + p["b1"])
    for i in range(NUM_BLOCKS):
        identity = h
        t = _layernorm_ref(h, p["blk_ln_g"][i], p["blk_ln_b"][i])
        h = silu(t @ p["blk_w"][i] + p["blk_b"][i]) + identity
    h = _layernorm_ref(h, p["ln2_g"], p["ln2_b"])
    return h @ p["w2"] + p["b2"]


if __name__ == "__main__":
    key = jax.random.PRNGKey(0)
    kx, kp = jax.random.split(key)

    batch = 8
    x = jax.random.normal(kx, (batch, INPUT_DIM), jnp.float32)
    params = make_params(kp)

    out = mlp_resnet_forward(x, params)
    out = jax.block_until_ready(out)

    ref = reference_forward(x, params)
    assert out.shape == (batch, OUTPUT_DIM)
    assert jnp.allclose(out, ref, atol=1e-5, rtol=1e-5), "mismatch vs JAX reference"

    print("KERNEL_OK")
</pallas_src>

<mosaic_0001>
module attributes {stable_mosaic.version = 11 : i64} {
  func.func @mlp_resnet_kernel(%arg0: i32, %arg1: memref<8x32xf32, #tpu.memory_space<vmem>>, %arg2: memref<2x32xf32, #tpu.memory_space<vmem>>, %arg3: memref<32x64xf32, #tpu.memory_space<vmem>>, %arg4: memref<9x64xf32, #tpu.memory_space<vmem>>, %arg5: memref<2x64x64xf32, #tpu.memory_space<vmem>>, %arg6: memref<64x16xf32, #tpu.memory_space<vmem>>, %arg7: memref<1x16xf32, #tpu.memory_space<vmem>>, %arg8: memref<8x16xf32, #tpu.memory_space<vmem>>) attributes {dimension_semantics = [#tpu.dimension_semantics<parallel>], iteration_bounds = array<i64: 1>, scalar_prefetch = 0 : i64, scratch_operands = 0 : i64, tpu.core_type = #tpu.core_type<tc>, window_params = [{transform_indices = @transform_0, window_bounds = array<i64: 8, 32>}, {pipeline_mode = #tpu.pipeline_mode<synchronous>, transform_indices = @transform_1, window_bounds = array<i64: 2, 32>}, {pipeline_mode = #tpu.pipeline_mode<synchronous>, transform_indices = @transform_2, window_bounds = array<i64: 32, 64>}, {pipeline_mode = #tpu.pipeline_mode<synchronous>, transform_indices = @transform_3, window_bounds = array<i64: 9, 64>}, {pipeline_mode = #tpu.pipeline_mode<synchronous>, transform_indices = @transform_4, window_bounds = array<i64: 2, 64, 64>}, {pipeline_mode = #tpu.pipeline_mode<synchronous>, transform_indices = @transform_5, window_bounds = array<i64: 64, 16>}, {pipeline_mode = #tpu.pipeline_mode<synchronous>, transform_indices = @transform_6, window_bounds = array<i64: 1, 16>}, {transform_indices = @transform_7, window_bounds = array<i64: 8, 16>}]} {
    %c0 = arith.constant 0 : index
    %c0_0 = arith.constant 0 : index
    %0 = vector.load %arg1[%c0, %c0_0] : memref<8x32xf32, #tpu.memory_space<vmem>>, vector<8x32xf32>
    %c0_1 = arith.constant 0 : index
    %c0_2 = arith.constant 0 : index
    %1 = vector.load %arg2[%c0_1, %c0_2] : memref<2x32xf32, #tpu.memory_space<vmem>>, vector<1x32xf32>
    %c1 = arith.constant 1 : index
    %c0_3 = arith.constant 0 : index
    %2 = vector.load %arg2[%c1, %c0_3] : memref<2x32xf32, #tpu.memory_space<vmem>>, vector<1x32xf32>
    %cst = arith.constant dense<0.000000e+00> : vector<8xf32>
    %3 = vector.multi_reduction <add>, %0, %cst [1] : vector<8x32xf32> to vector<8xf32>
    %4 = vector.shape_cast %3 : vector<8xf32> to vector<8x1xf32>
    %cst_4 = arith.constant 3.200000e+01 : f32
    %5 = vector.broadcast %cst_4 : f32 to vector<8x1xf32>
    %6 = arith.divf %4, %5 : vector<8x1xf32>
    %7 = vector.broadcast %6 : vector<8x1xf32> to vector<8x32xf32>
    %8 = arith.subf %0, %7 : vector<8x32xf32>
    %9 = arith.mulf %8, %8 : vector<8x32xf32>
    %cst_5 = arith.constant dense<0.000000e+00> : vector<8xf32>
    %10 = vector.multi_reduction <add>, %9, %cst_5 [1] : vector<8x32xf32> to vector<8xf32>
    %11 = vector.shape_cast %10 : vector<8xf32> to vector<8x1xf32>
    %cst_6 = arith.constant 3.200000e+01 : f32
    %12 = vector.broadcast %cst_6 : f32 to vector<8x1xf32>
    %13 = arith.divf %11, %12 : vector<8x1xf32>
    %cst_7 = arith.constant 9.99999974E-6 : f32
    %14 = vector.broadcast %cst_7 : f32 to vector<8x1xf32>
    %15 = arith.addf %13, %14 : vector<8x1xf32>
    %16 = math.rsqrt %15 : vector<8x1xf32>
    %17 = vector.broadcast %16 : vector<8x1xf32> to vector<8x32xf32>
    %18 = arith.mulf %8, %17 : vector<8x32xf32>
    %19 = vector.broadcast %1 : vector<1x32xf32> to vector<8x32xf32>
    %20 = arith.mulf %18, %19 : vector<8x32xf32>
    %21 = vector.broadcast %2 : vector<1x32xf32> to vector<8x32xf32>
    %22 = arith.addf %20, %21 : vector<8x32xf32>
    %c0_8 = arith.constant 0 : index
    %c0_9 = arith.constant 0 : index
    %23 = vector.load %arg3[%c0_8, %c0_9] : memref<32x64xf32, #tpu.memory_space<vmem>>, vector<32x64xf32>
    %cst_10 = arith.constant dense<0.000000e+00> : vector<8x64xf32>
    %24 = tpu.matmul %22, %23, %cst_10 {dimension_numbers = #tpu.dot_dimension_numbers<[1], [0], [0], [1], [0, 0, 1, 1], [], []>} : vector<8x32xf32>, vector<32x64xf32>, vector<8x64xf32> -> vector<8x64xf32>
    %c0_11 = arith.constant 0 : index
    %c0_12 = arith.constant 0 : index
    %25 = vector.load %arg4[%c0_11, %c0_12] : memref<9x64xf32, #tpu.memory_space<vmem>>, vector<1x64xf32>
    %26 = vector.broadcast %25 : vector<1x64xf32> to vector<8x64xf32>
    %27 = arith.addf %24, %26 : vector<8x64xf32>
    %cst_13 = arith.constant 5.000000e-01 : f32
    %28 = vector.broadcast %cst_13 : f32 to vector<8x64xf32>
    %29 = arith.mulf %28, %27 : vector<8x64xf32>
    %cst_14 = arith.constant 5.000000e-01 : f32
    %30 = vector.broadcast %cst_14 : f32 to vector<8x64xf32>
    %31 = arith.mulf %30, %27 : vector<8x64xf32>
    %32 = math.tanh %31 : vector<8x64xf32>
    %cst_15 = arith.constant 1.000000e+00 : f32
    %33 = vector.broadcast %cst_15 : f32 to vector<8x64xf32>
    %34 = arith.addf %33, %32 : vector<8x64xf32>
    %35 = arith.mulf %29, %34 : vector<8x64xf32>
    %c3 = arith.constant 3 : index
    %c0_16 = arith.constant 0 : index
    %36 = vector.load %arg4[%c3, %c0_16] : memref<9x64xf32, #tpu.memory_space<vmem>>, vector<1x64xf32>
    %c4 = arith.constant 4 : index
    %c0_17 = arith.constant 0 : index
    %37 = vector.load %arg4[%c4, %c0_17] : memref<9x64xf32, #tpu.memory_space<vmem>>, vector<1x64xf32>
    %cst_18 = arith.constant dense<0.000000e+00> : vector<8xf32>
    %38 = vector.multi_reduction <add>, %35, %cst_18 [1] : vector<8x64xf32> to vector<8xf32>
    %39 = vector.shape_cast %38 : vector<8xf32> to vector<8x1xf32>
    %cst_19 = arith.constant 6.400000e+01 : f32
    %40 = vector.broadcast %cst_19 : f32 to vector<8x1xf32>
    %41 = arith.divf %39, %40 : vector<8x1xf32>
    %42 = vector.broadcast %41 : vector<8x1xf32> to vector<8x64xf32>
    %43 = arith.subf %35, %42 : vector<8x64xf32>
    %44 = arith.mulf %43, %43 : vector<8x64xf32>
    %cst_20 = arith.constant dense<0.000000e+00> : vector<8xf32>
    %45 = vector.multi_reduction <add>, %44, %cst_20 [1] : vector<8x64xf32> to vector<8xf32>
    %46 = vector.shape_cast %45 : vector<8xf32> to vector<8x1xf32>
    %cst_21 = arith.constant 6.400000e+01 : f32
    %47 = vector.broadcast %cst_21 : f32 to vector<8x1xf32>
    %48 = arith.divf %46, %47 : vector<8x1xf32>
    %cst_22 = arith.constant 9.99999974E-6 : f32
    %49 = vector.broadcast %cst_22 : f32 to vector<8x1xf32>
    %50 = arith.addf %48, %49 : vector<8x1xf32>
    %51 = math.rsqrt %50 : vector<8x1xf32>
    %52 = vector.broadcast %51 : vector<8x1xf32> to vector<8x64xf32>
    %53 = arith.mulf %43, %52 : vector<8x64xf32>
    %54 = vector.broadcast %36 : vector<1x64xf32> to vector<8x64xf32>
    %55 = arith.mulf %53, %54 : vector<8x64xf32>
    %56 = vector.broadcast %37 : vector<1x64xf32> to vector<8x64xf32>
    %57 = arith.addf %55, %56 : vector<8x64xf32>
    %c0_23 = arith.constant 0 : index
    %c0_24 = arith.constant 0 : index
    %c0_25 = arith.constant 0 : index
    %58 = vector.load %arg5[%c0_23, %c0_24, %c0_25] : memref<2x64x64xf32, #tpu.memory_space<vmem>>, vector<1x64x64xf32>
    %59 = vector.shape_cast %58 : vector<1x64x64xf32> to vector<64x64xf32>
    %cst_26 = arith.constant dense<0.000000e+00> : vector<8x64xf32>
    %60 = tpu.matmul %57, %59, %cst_26 {dimension_numbers = #tpu.dot_dimension_numbers<[1], [0], [0], [1], [0, 0, 1, 1], [], []>} : vector<8x64xf32>, vector<64x64xf32>, vector<8x64xf32> -> vector<8x64xf32>
    %c5 = arith.constant 5 : index
    %c0_27 = arith.constant 0 : index
    %61 = vector.load %arg4[%c5, %c0_27] : memref<9x64xf32, #tpu.memory_space<vmem>>, vector<1x64xf32>
    %62 = vector.broadcast %61 : vector<1x64xf32> to vector<8x64xf32>
    %63 = arith.addf %60, %62 : vector<8x64xf32>
    %cst_28 = arith.constant 5.000000e-01 : f32
    %64 = vector.broadcast %cst_28 : f32 to vector<8x64xf32>
    %65 = arith.mulf %64, %63 : vector<8x64xf32>
    %cst_29 = arith.constant 5.000000e-01 : f32
    %66 = vector.broadcast %cst_29 : f32 to vector<8x64xf32>
    %67 = arith.mulf %66, %63 : vector<8x64xf32>
    %68 = math.tanh %67 : vector<8x64xf32>
    %cst_30 = arith.constant 1.000000e+00 : f32
    %69 = vector.broadcast %cst_30 : f32 to vector<8x64xf32>
    %70 = arith.addf %69, %68 : vector<8x64xf32>
    %71 = arith.mulf %65, %70 : vector<8x64xf32>
    %72 = arith.addf %71, %35 : vector<8x64xf32>
    %c6 = arith.constant 6 : index
    %c0_31 = arith.constant 0 : index
    %73 = vector.load %arg4[%c6, %c0_31] : memref<9x64xf32, #tpu.memory_space<vmem>>, vector<1x64xf32>
    %c7 = arith.constant 7 : index
    %c0_32 = arith.constant 0 : index
    %74 = vector.load %arg4[%c7, %c0_32] : memref<9x64xf32, #tpu.memory_space<vmem>>, vector<1x64xf32>
    %cst_33 = arith.constant dense<0.000000e+00> : vector<8xf32>
    %75 = vector.multi_reduction <add>, %72, %cst_33 [1] : vector<8x64xf32> to vector<8xf32>
    %76 = vector.shape_cast %75 : vector<8xf32> to vector<8x1xf32>
    %cst_34 = arith.constant 6.400000e+01 : f32
    %77 = vector.broadcast %cst_34 : f32 to vector<8x1xf32>
    %78 = arith.divf %76, %77 : vector<8x1xf32>
    %79 = vector.broadcast %78 : vector<8x1xf32> to vector<8x64xf32>
    %80 = arith.subf %72, %79 : vector<8x64xf32>
    %81 = arith.mulf %80, %80 : vector<8x64xf32>
    %cst_35 = arith.constant dense<0.000000e+00> : vector<8xf32>
    %82 = vector.multi_reduction <add>, %81, %cst_35 [1] : vector<8x64xf32> to vector<8xf32>
    %83 = vector.shape_cast %82 : vector<8xf32> to vector<8x1xf32>
    %cst_36 = arith.constant 6.400000e+01 : f32
    %84 = vector.broadcast %cst_36 : f32 to vector<8x1xf32>
    %85 = arith.divf %83, %84 : vector<8x1xf32>
    %cst_37 = arith.constant 9.99999974E-6 : f32
    %86 = vector.broadcast %cst_37 : f32 to vector<8x1xf32>
    %87 = arith.addf %85, %86 : vector<8x1xf32>
    %88 = math.rsqrt %87 : vector<8x1xf32>
    %89 = vector.broadcast %88 : vector<8x1xf32> to vector<8x64xf32>
    %90 = arith.mulf %80, %89 : vector<8x64xf32>
    %91 = vector.broadcast %73 : vector<1x64xf32> to vector<8x64xf32>
    %92 = arith.mulf %90, %91 : vector<8x64xf32>
    %93 = vector.broadcast %74 : vector<1x64xf32> to vector<8x64xf32>
    %94 = arith.addf %92, %93 : vector<8x64xf32>
    %c1_38 = arith.constant 1 : index
    %c0_39 = arith.constant 0 : index
    %c0_40 = arith.constant 0 : index
    %95 = vector.load %arg5[%c1_38, %c0_39, %c0_40] : memref<2x64x64xf32, #tpu.memory_space<vmem>>, vector<1x64x64xf32>
    %96 = vector.shape_cast %95 : vector<1x64x64xf32> to vector<64x64xf32>
    %cst_41 = arith.constant dense<0.000000e+00> : vector<8x64xf32>
    %97 = tpu.matmul %94, %96, %cst_41 {dimension_numbers = #tpu.dot_dimension_numbers<[1], [0], [0], [1], [0, 0, 1, 1], [], []>} : vector<8x64xf32>, vector<64x64xf32>, vector<8x64xf32> -> vector<8x64xf32>
    %c8 = arith.constant 8 : index
    %c0_42 = arith.constant 0 : index
    %98 = vector.load %arg4[%c8, %c0_42] : memref<9x64xf32, #tpu.memory_space<vmem>>, vector<1x64xf32>
    %99 = vector.broadcast %98 : vector<1x64xf32> to vector<8x64xf32>
    %100 = arith.addf %97, %99 : vector<8x64xf32>
    %cst_43 = arith.constant 5.000000e-01 : f32
    %101 = vector.broadcast %cst_43 : f32 to vector<8x64xf32>
    %102 = arith.mulf %101, %100 : vector<8x64xf32>
    %cst_44 = arith.constant 5.000000e-01 : f32
    %103 = vector.broadcast %cst_44 : f32 to vector<8x64xf32>
    %104 = arith.mulf %103, %100 : vector<8x64xf32>
    %105 = math.tanh %104 : vector<8x64xf32>
    %cst_45 = arith.constant 1.000000e+00 : f32
    %106 = vector.broadcast %cst_45 : f32 to vector<8x64xf32>
    %107 = arith.addf %106, %105 : vector<8x64xf32>
    %108 = arith.mulf %102, %107 : vector<8x64xf32>
    %109 = arith.addf %108, %72 : vector<8x64xf32>
    %c1_46 = arith.constant 1 : index
    %c0_47 = arith.constant 0 : index
    %110 = vector.load %arg4[%c1_46, %c0_47] : memref<9x64xf32, #tpu.memory_space<vmem>>, vector<1x64xf32>
    %c2 = arith.constant 2 : index
    %c0_48 = arith.constant 0 : index
    %111 = vector.load %arg4[%c2, %c0_48] : memref<9x64xf32, #tpu.memory_space<vmem>>, vector<1x64xf32>
    %cst_49 = arith.constant dense<0.000000e+00> : vector<8xf32>
    %112 = vector.multi_reduction <add>, %109, %cst_49 [1] : vector<8x64xf32> to vector<8xf32>
    %113 = vector.shape_cast %112 : vector<8xf32> to vector<8x1xf32>
    %cst_50 = arith.constant 6.400000e+01 : f32
    %114 = vector.broadcast %cst_50 : f32 to vector<8x1xf32>
    %115 = arith.divf %113, %114 : vector<8x1xf32>
    %116 = vector.broadcast %115 : vector<8x1xf32> to vector<8x64xf32>
    %117 = arith.subf %109, %116 : vector<8x64xf32>
    %118 = arith.mulf %117, %117 : vector<8x64xf32>
    %cst_51 = arith.constant dense<0.000000e+00> : vector<8xf32>
    %119 = vector.multi_reduction <add>, %118, %cst_51 [1] : vector<8x64xf32> to vector<8xf32>
    %120 = vector.shape_cast %119 : vector<8xf32> to vector<8x1xf32>
    %cst_52 = arith.constant 6.400000e+01 : f32
    %121 = vector.broadcast %cst_52 : f32 to vector<8x1xf32>
    %122 = arith.divf %120, %121 : vector<8x1xf32>
    %cst_53 = arith.constant 9.99999974E-6 : f32
    %123 = vector.broadcast %cst_53 : f32 to vector<8x1xf32>
    %124 = arith.addf %122, %123 : vector<8x1xf32>
    %125 = math.rsqrt %124 : vector<8x1xf32>
    %126 = vector.broadcast %125 : vector<8x1xf32> to vector<8x64xf32>
    %127 = arith.mulf %117, %126 : vector<8x64xf32>
    %128 = vector.broadcast %110 : vector<1x64xf32> to vector<8x64xf32>
    %129 = arith.mulf %127, %128 : vector<8x64xf32>
    %130 = vector.broadcast %111 : vector<1x64xf32> to vector<8x64xf32>
    %131 = arith.addf %129, %130 : vector<8x64xf32>
    %c0_54 = arith.constant 0 : index
    %c0_55 = arith.constant 0 : index
    %132 = vector.load %arg6[%c0_54, %c0_55] : memref<64x16xf32, #tpu.memory_space<vmem>>, vector<64x16xf32>
    %cst_56 = arith.constant dense<0.000000e+00> : vector<8x16xf32>
    %133 = tpu.matmul %131, %132, %cst_56 {dimension_numbers = #tpu.dot_dimension_numbers<[1], [0], [0], [1], [0, 0, 1, 1], [], []>} : vector<8x64xf32>, vector<64x16xf32>, vector<8x16xf32> -> vector<8x16xf32>
    %c0_57 = arith.constant 0 : index
    %c0_58 = arith.constant 0 : index
    %134 = vector.load %arg7[%c0_57, %c0_58] : memref<1x16xf32, #tpu.memory_space<vmem>>, vector<1x16xf32>
    %135 = vector.broadcast %134 : vector<1x16xf32> to vector<8x16xf32>
    %136 = arith.addf %133, %135 : vector<8x16xf32>
    %c0_59 = arith.constant 0 : index
    %c0_60 = arith.constant 0 : index
    %137 = vector.load %arg8[%c0_59, %c0_60] : memref<8x16xf32, #tpu.memory_space<vmem>>, vector<8x16xf32>
    tpu.vector_store %arg8[%c0_59, %c0_60], %136 {strides = array<i32>} : memref<8x16xf32, #tpu.memory_space<vmem>>, vector<8x16xf32>,
    return
  }
  func.func @transform_0(%arg0: i32) -> (i32, i32) {
    %c0_i32 = arith.constant 0 : i32
    %c0_i32_0 = arith.constant 0 : i32
    return %arg0, %c0_i32 : i32, i32
  }
  func.func @transform_1(%arg0: i32) -> (i32, i32) {
    %c0_i32 = arith.constant 0 : i32
    %c0_i32_0 = arith.constant 0 : i32
    %c0_i32_1 = arith.constant 0 : i32
    return %c0_i32, %c0_i32_0 : i32, i32
  }
  func.func @transform_2(%arg0: i32) -> (i32, i32) {
    %c0_i32 = arith.constant 0 : i32
    %c0_i32_0 = arith.constant 0 : i32
    %c0_i32_1 = arith.constant 0 : i32
    return %c0_i32, %c0_i32_0 : i32, i32
  }
  func.func @transform_3(%arg0: i32) -> (i32, i32) {
    %c0_i32 = arith.constant 0 : i32
    %c0_i32_0 = arith.constant 0 : i32
    %c0_i32_1 = arith.constant 0 : i32
    return %c0_i32, %c0_i32_0 : i32, i32
  }
  func.func @transform_4(%arg0: i32) -> (i32, i32, i32) {
    %c0_i32 = arith.constant 0 : i32
    %c0_i32_0 = arith.constant 0 : i32
    %c0_i32_1 = arith.constant 0 : i32
    %c0_i32_2 = arith.constant 0 : i32
    return %c0_i32, %c0_i32_0, %c0_i32_1 : i32, i32, i32
  }
  func.func @transform_5(%arg0: i32) -> (i32, i32) {
    %c0_i32 = arith.constant 0 : i32
    %c0_i32_0 = arith.constant 0 : i32
    %c0_i32_1 = arith.constant 0 : i32
    return %c0_i32, %c0_i32_0 : i32, i32
  }
  func.func @transform_6(%arg0: i32) -> (i32, i32) {
    %c0_i32 = arith.constant 0 : i32
    %c0_i32_0 = arith.constant 0 : i32
    %c0_i32_1 = arith.constant 0 : i32
    return %c0_i32, %c0_i32_0 : i32, i32
  }
  func.func @transform_7(%arg0: i32) -> (i32, i32) {
    %c0_i32 = arith.constant 0 : i32
    %c0_i32_0 = arith.constant 0 : i32
    return %arg0, %c0_i32 : i32, i32
  }
}

</mosaic_0001>

<bundles_post_ra>
// kernel: tpu_custom_call.1
= control target key start
LH: loop header
LB: loop body
LE: loop exit
PB: predicated region body
PF: predicated region fallthrough
CT: control target
= control target key end

     0   :  { %12 = vsyncpa [#allocation3], 0  ;;  %s927_s0 = inlined_call_operand.vmem [shape: f32[8,32], index: 0, kind: input, shape index: {}]   ;;  %s928_s1 = inlined_call_operand.vmem [shape: f32[2,32], index: 1, kind: input, shape index: {}]   ;;  %s929_s2 = inlined_call_operand.vmem [shape: f32[32,64], index: 2, kind: input, shape index: {}]   ;;  %s930_s3 = inlined_call_operand.vmem [shape: f32[9,64], index: 3, kind: input, shape index: {}]   ;;  %s931_s4 = inlined_call_operand.hbm [shape: f32[2,64,64], index: 4, kind: input, shape index: {}]   ;;  %s932_s5 = inlined_call_operand.vmem [shape: f32[64,16], index: 5, kind: input, shape index: {}]   ;;  %s933_s6 = inlined_call_operand.vmem [shape: f32[1,16], index: 6, kind: input, shape index: {}]   ;;  %s934_s7 = inlined_call_operand.hbm [shape: f32[8,16], index: 7, kind: output, shape index: {}]  }
   0x1   :  { %13 = vsyncpa [#allocation4], 0  ;;  %s747_s24 = smov [#allocation2]   ;;  %s699_s28 = scalar_lea.hbm %s931_s4, 2048 }
   0x2   :  { %s27_s25 = sshll.u32 %s747_s24, 4  ;;  %p700_p0 = scmp.ne.s32.totalorder %s931_s4, %s699_s28  ;;  %s28_s25 = int_to_ptr.vmem [resolvable:$true] %s27_s25 }
   0x3   :  { %p703_p1 = scmp.lt.u32.totalorder %s699_s28, %s931_s4 }
   0x5   :  { %p705_p2 = pnand %p703_p1, %p700_p0 }
   0x7   :  { %708 = shalt.err (!%p705_p2)
}
   0x8   :  { %s709_s10 = scalar_lea.vmem %s28_s25, 2048  ;;  %p714_p4 = scmp.lt.s32.totalorder %s28_s25, %s28_s25 }
   0x9   :  { %p710_p3 = scmp.ne.s32.totalorder %s28_s25, %s709_s10  ;;  %p715_p5 = scmp.lt.s32.totalorder %s709_s10, %s709_s10 }
   0xb   :  { %p716_p6 = por %p715_p5, %p714_p4 }
   0xd   :  { %p717_p7 = pnand %p716_p6, %p710_p3 }
   0xf   :  { %720 = shalt.err (!%p717_p7)
}
  0x10   :  { %s748_s11 = smov 128   ;;  %s749_s12 = smov 8  }
  0x11   :  { %33 = dma.hbm_to_vmem [thread:$0]  %s931_s4, 2048, %s28_s25, [#allocation3], %s748_s11, %s748_s11, %s749_s12  }
  0x12   :  { %743 = dma.done.wait [#allocation3], 2048  }
  0x13   :  { %744 = vsyncadd [#allocation3], 4294965248  ;;  %vm44_vm0 = vcmask 261120   ;;  %v41_v0 = vld [vmem:[%s927_s0] sm:$0xff]  ;;  %v70_v8 = vld [vmem:[%s929_s2 + $0x8] sm:$0xff]  ;;  %v750_v10 = vmov 0.0|0.0  }
  0x14   :  { %v45_v1 = vsel %vm44_vm0, %v41_v0, 0.0  ;;  %v69_v7 = vld [vmem:[%s929_s2] sm:$0xff]  ;;  %v71_v9 = vld [vmem:[%s929_s2 + $0x10] sm:$0xff]  ;;  %636 = vmatprep.subr.bf16.mxu0 %v750_v10  ;;  %v72_v12 = vld [vmem:[%s929_s2 + $0x18] sm:$0xff]  ;;  %vm751_vm1 = vmmov 0   ;;  %v752_v13 = vmov 0.0   ;;  %642 = vmatprep.subr.bf16.mxu1 %v750_v10 }
  0x15   :  { %46 = vadd.xlane.f32.xlu0 %v45_v1  ;;  %v637_v11 = vpack.c.bf16 %v70_v8, %v69_v7  ;;  %576 = vmatprep.mubr.msk.f32.mxu0 %vm751_vm1, %v752_v13  ;;  %v640_v14 = vpack.c.bf16 %v72_v12, %v71_v9  ;;  %v520_v19 = vld [vmem:[%s928_s1] ss:$0 sm:$0xff]  ;;  %v521_v21 = vld [vmem:[%s928_s1 + $0x1] ss:$0 sm:$0xff]  ;;  %vm157_vm2 = vcmask 523264   ;;  %v183_v39 = vld [vmem:[#allocation2 + $0x8] sm:$0xff] }
  0x16   :  { %595 = vmatprep.mubr.msk.f32.mxu1 %vm751_vm1, %v752_v13  ;;  %v522_v24 = vld [vmem:[%s930_s3] ss:$0 sm:$0xff]  ;;  %v184_v41 = vld [vmem:[#allocation2 + $0x10] sm:$0xff]  ;;  %v185_v42 = vld [vmem:[#allocation2 + $0x18] sm:$0xff]  ;;  %s753_s10 = smov [#allocation5]   ;;  %vm503_vm3 = vcmask 130048  }
  0x17   :  { %638 = vmatpush3.bf16.msra.mxu0 %v637_v11  ;;  %v182_v38 = vld [vmem:[#allocation2] sm:$0xff]  ;;  %v646_v43 = vpack.c.bf16 %v185_v42, %v184_v41  ;;  %v187_v45 = vld [vmem:[#allocation2 + $0x28] sm:$0xff]  ;;  %v188_v47 = vld [vmem:[#allocation2 + $0x30] sm:$0xff]  ;;  %s511_s11 = sshll.u32 %s753_s10, 4  ;;  %s512_s11 = int_to_ptr.vmem [resolvable:$true] %s511_s11 }
  0x18   :  { %639 = vmatprep.subr.bf16.mxu0 %v750_v10  ;;  %v643_v40 = vpack.c.bf16 %v183_v39, %v182_v38  ;;  %v186_v44 = vld [vmem:[#allocation2 + $0x20] sm:$0xff]  ;;  %v189_v48 = vld [vmem:[#allocation2 + $0x38] sm:$0xff]  ;;  %v300_v12 = vld [vmem:[#allocation2 + $0x48] sm:$0xff]  ;;  %s721_s12 = scalar_lea.vmem %s512_s11, 128  ;;  %p726_p9 = scmp.lt.s32.totalorder %s512_s11, %s512_s11 }
  0x19   :  { %v649_v46 = vpack.c.bf16 %v187_v45, %v186_v44  ;;  %v652_v49 = vpack.c.bf16 %v189_v48, %v188_v47  ;;  %v524_v54 = vld [vmem:[%s930_s3 + $0x3] ss:$0 sm:$0xff]  ;;  %v525_v56 = vld [vmem:[%s930_s3 + $0x4] ss:$0 sm:$0xff]  ;;  %v526_v59 = vld [vmem:[%s930_s3 + $0x5] ss:$0 sm:$0xff]  ;;  %p722_p8 = scmp.ne.s32.totalorder %s512_s11, %s721_s12  ;;  %p727_p10 = scmp.lt.s32.totalorder %s721_s12, %s721_s12 }
  0x1a   :  { %644 = vmatpush3.bf16.msra.mxu1 %v643_v40  ;;  %v299_v11 = vld [vmem:[#allocation2 + $0x40] sm:$0xff]  ;;  %v416_v48 = vld [vmem:[%s932_s5 + $0x8] sm:$0xff] }
  0x1b   :  { %641 = vmatpush3.bf16.msra.mxu0 %v640_v14  ;;  %645 = vmatprep.subr.bf16.mxu1 %v750_v10  ;;  %v301_v14 = vld [vmem:[#allocation2 + $0x50] sm:$0xff]  ;;  %v415_v47 = vld [vmem:[%s932_s5] sm:$0xff]  ;;  %p728_p11 = por %p727_p10, %p726_p9 }
  0x1c   :  { %654 = vmatprep.subr.bf16.mxu0 %v750_v10 }
  0x1d   :  { %p729_p12 = pnand %p728_p11, %p722_p8 }
  0x1e   :  { %647 = vmatpush3.bf16.msra.mxu1 %v646_v43 }
  0x1f   :  { %648 = vmatprep.subr.bf16.mxu1 %v750_v10 }
  0x22   :  { %650 = vmatpush3.bf16.msra.mxu1 %v649_v46 }
  0x23   :  { %651 = vmatprep.subr.bf16.mxu1 %v750_v10 }
  0x26   :  { %653 = vmatpush3.bf16.msra.mxu1 %v652_v49  ;;  %v667_v49 = vpack.c.bf16 %v416_v48, %v415_v47 }
  0x27   :  { %666 = vmatprep.subr.bf16.mxu1 %v750_v10 }
  0xa2   :  { %v47_v2 = vpop.xlane.xlu0 %46 }
  0xa3   :  { %v49_v3 = vmul.f32 0.03125, %v47_v2 }
  0xa5   :  { %v50_v4 = vsub.f32 %v41_v0, %v49_v3 }
  0xa7   :  { %v51_v5 = vmul.f32 %v50_v4, %v50_v4 }
  0xa9   :  { %v52_v6 = vsel %vm44_vm0, %v51_v5, 0.0 }
  0xaa   :  { %53 = vadd.xlane.f32.xlu0 %v52_v6 }
 0x137   :  { %v54_v15 = vpop.xlane.xlu0 %53 }
 0x138   :  { %v55_v16 = vmul.f32 0.03125, %v54_v15  ;;  %v302_v15 = vld [vmem:[#allocation2 + $0x58] sm:$0xff] }
 0x13a   :  { %v56_v17 = vadd.f32 1e-05, %v55_v16  ;;  %v658_v16 = vpack.c.bf16 %v302_v15, %v301_v14 }
 0x13c   :  { %685 = vrsqrt.f32 %v56_v17  ;;  %v303_v17 = vld [vmem:[#allocation2 + $0x60] sm:$0xff] }
 0x146   :  { %v686_v18 = vpop.eup %685 }
 0x147   :  { %v58_v20 = vmul.f32 %v686_v18, %v50_v4  ;;  %v304_v18 = vld [vmem:[#allocation2 + $0x68] sm:$0xff] }
 0x149   :  { %v63_v22 = vmul.f32 %v520_v19, %v58_v20  ;;  %v661_v19 = vpack.c.bf16 %v304_v18, %v303_v17  ;;  %v305_v20 = vld [vmem:[#allocation2 + $0x70] sm:$0xff] }
 0x14b   :  { %v68_v23 = vadd.f32 %v521_v21, %v63_v22  ;;  %v306_v21 = vld [vmem:[#allocation2 + $0x78] sm:$0xff] }
 0x14c   :  { %v664_v22 = vpack.c.bf16 %v306_v21, %v305_v20 }
 0x14d   :  { %577 = vmatmul.mubr.msk.f32.vlgmr.msra.gmra.mrb[0].mxu0 %vm44_vm0, %v68_v23 }
 0x14e   :  { %614 = vmatprep.mubr.msk.f32.mxu0 %vm751_vm1, %v752_v13 }
 0x220   :  { %v147_v25 = vpop.f32.mrb[0].mxu0 }
 0x221   :  { %v148_v26 = vadd.f32 %v522_v24, %v147_v25  ;;  %v578_v27 = vpop.f32.mrb[1].mxu0 }
 0x222   :  { %v528_v27 = vld [vmem:[%s930_s3 + $0x6] ss:$0 sm:$0xff] }
 0x223   :  { %v151_v28 = vmul.f32 0.5, %v148_v26 }
 0x225   :  { %687 = vtanh.f32 %v151_v28 }
 0x22f   :  { %v688_v29 = vpop.eup %687 }
 0x230   :  { %v153_v30 = vadd.f32 1.0, %v688_v29  ;;  %v529_v29 = vld [vmem:[%s930_s3 + $0x7] ss:$0 sm:$0xff] }
 0x232   :  { %v154_v31 = vmul.f32 %v153_v30, %v151_v28 }
 0x234   :  { %v158_v32 = vsel %vm157_vm2, %v154_v31, 0.0 }
 0x235   :  { %159 = vadd.xlane.f32.xlu1 %v158_v32  ;;  %v530_v32 = vld [vmem:[%s930_s3 + $0x8] ss:$0 sm:$0xff] }
 0x2c2   :  { %v160_v33 = vpop.xlane.xlu1 %159 }
 0x2c3   :  { %v162_v34 = vmul.f32 0.015625, %v160_v33 }
 0x2c5   :  { %v163_v35 = vsub.f32 %v154_v31, %v162_v34 }
 0x2c7   :  { %v164_v36 = vmul.f32 %v163_v35, %v163_v35 }
 0x2c9   :  { %v165_v37 = vsel %vm157_vm2, %v164_v36, 0.0 }
 0x2ca   :  { %166 = vadd.xlane.f32.xlu1 %v165_v37 }
 0x357   :  { %v167_v50 = vpop.xlane.xlu1 %166 }
 0x358   :  { %v168_v51 = vmul.f32 0.015625, %v167_v50  ;;  %v417_v50 = vld [vmem:[%s932_s5 + $0x10] sm:$0xff] }
 0x35a   :  { %v169_v52 = vadd.f32 1e-05, %v168_v51  ;;  %v418_v51 = vld [vmem:[%s932_s5 + $0x18] sm:$0xff] }
 0x35c   :  { %689 = vrsqrt.f32 %v169_v52  ;;  %v670_v52 = vpack.c.bf16 %v418_v51, %v417_v50 }
 0x366   :  { %v690_v53 = vpop.eup %689 }
 0x367   :  { %v171_v55 = vmul.f32 %v690_v53, %v163_v35  ;;  %v419_v53 = vld [vmem:[%s932_s5 + $0x20] sm:$0xff] }
 0x369   :  { %v176_v57 = vmul.f32 %v524_v54, %v171_v55  ;;  %v420_v54 = vld [vmem:[%s932_s5 + $0x28] sm:$0xff] }
 0x36a   :  { %v673_v55 = vpack.c.bf16 %v420_v54, %v419_v53 }
 0x36b   :  { %v181_v58 = vadd.f32 %v525_v56, %v176_v57  ;;  %v421_v56 = vld [vmem:[%s932_s5 + $0x30] sm:$0xff]  ;;  %v422_v57 = vld [vmem:[%s932_s5 + $0x38] sm:$0xff] }
 0x36d   :  { %596 = vmatmul.mubr.msk.f32.vlgmr.msra.gmra.mrb[0].mxu1 %vm157_vm2, %v181_v58  ;;  %v676_v58 = vpack.c.bf16 %v422_v57, %v421_v56 }
 0x36e   :  { %633 = vmatprep.mubr.msk.f32.mxu1 %vm751_vm1, %v752_v13  ;;  %v655_v13 = vpack.c.bf16 %v300_v12, %v299_v11  ;;  %668 = vmatpush3.bf16.msra.mxu1 %v667_v49 }
 0x36f   :  { %669 = vmatprep.subr.bf16.mxu1 %v750_v10 }
 0x370   :  { %656 = vmatpush3.bf16.msra.mxu0 %v655_v13 }
 0x371   :  { %657 = vmatprep.subr.bf16.mxu0 %v750_v10 }
 0x372   :  { %671 = vmatpush3.bf16.msra.mxu1 %v670_v52 }
 0x373   :  { %672 = vmatprep.subr.bf16.mxu1 %v750_v10 }
 0x374   :  { %659 = vmatpush3.bf16.msra.mxu0 %v658_v16 }
 0x375   :  { %660 = vmatprep.subr.bf16.mxu0 %v750_v10 }
 0x376   :  { %674 = vmatpush3.bf16.msra.mxu1 %v673_v55 }
 0x377   :  { %675 = vmatprep.subr.bf16.mxu1 %v750_v10 }
 0x378   :  { %662 = vmatpush3.bf16.msra.mxu0 %v661_v19 }
 0x379   :  { %663 = vmatprep.subr.bf16.mxu0 %v750_v10 }
 0x37a   :  { %677 = vmatpush3.bf16.msra.mxu1 %v676_v58 }
 0x37c   :  { %665 = vmatpush3.bf16.msra.mxu0 %v664_v22 }
 0x440   :  { %v264_v60 = vpop.f32.mrb[0].mxu1 }
 0x441   :  { %v265_v61 = vadd.f32 %v526_v59, %v264_v60  ;;  %v597_v62 = vpop.f32.mrb[1].mxu1 }
 0x443   :  { %v268_v63 = vmul.f32 0.5, %v265_v61 }
 0x445   :  { %691 = vtanh.f32 %v268_v63 }
 0x44f   :  { %v692_v0 = vpop.eup %691 }
 0x450   :  { %v270_v1 = vadd.f32 1.0, %v692_v0  ;;  %v533_v0 = vld [vmem:[%s930_s3 + $0x2] ss:$0 sm:$0xff] }
 0x452   :  { %v271_v2 = vmul.f32 %v270_v1, %v268_v63  ;;  %v532_v63 = vld [vmem:[%s930_s3 + $0x1] ss:$0 sm:$0xff] }
 0x454   :  { %v272_v3 = vadd.f32 %v271_v2, %v154_v31 }
 0x456   :  { %v275_v4 = vsel %vm157_vm2, %v272_v3, 0.0 }
 0x457   :  { %276 = vadd.xlane.f32.xlu0 %v275_v4 }
 0x4e4   :  { %v277_v5 = vpop.xlane.xlu0 %276 }
 0x4e5   :  { %v278_v6 = vmul.f32 0.015625, %v277_v5 }
 0x4e7   :  { %v279_v7 = vsub.f32 %v272_v3, %v278_v6 }
 0x4e9   :  { %v280_v8 = vmul.f32 %v279_v7, %v279_v7 }
 0x4eb   :  { %v281_v9 = vsel %vm157_vm2, %v280_v8, 0.0 }
 0x4ec   :  { %282 = vadd.xlane.f32.xlu1 %v281_v9 }
 0x579   :  { %v283_v23 = vpop.xlane.xlu1 %282 }
 0x57a   :  { %v284_v24 = vmul.f32 0.015625, %v283_v23 }
 0x57c   :  { %v285_v25 = vadd.f32 1e-05, %v284_v24 }
 0x57e   :  { %693 = vrsqrt.f32 %v285_v25 }
 0x588   :  { %v694_v26 = vpop.eup %693 }
 0x589   :  { %v287_v28 = vmul.f32 %v694_v26, %v279_v7 }
 0x58b   :  { %v292_v30 = vmul.f32 %v528_v27, %v287_v28 }
 0x58d   :  { %v297_v31 = vadd.f32 %v529_v29, %v292_v30 }
 0x58f   :  { %615 = vmatmul.mubr.msk.f32.vlgmr.msra.gmra.mrb[2].mxu0 %vm157_vm2, %v297_v31 }
 0x662   :  { %v381_v33 = vpop.f32.mrb[2].mxu0 }
 0x663   :  { %v382_v34 = vadd.f32 %v530_v32, %v381_v33  ;;  %v616_v35 = vpop.f32.mrb[3].mxu0 }
 0x665   :  { %v385_v36 = vmul.f32 0.5, %v382_v34 }
 0x667   :  { %695 = vtanh.f32 %v385_v36 }
 0x671   :  { %v696_v37 = vpop.eup %695 }
 0x672   :  { %v387_v38 = vadd.f32 1.0, %v696_v37 }
 0x674   :  { %v388_v39 = vmul.f32 %v387_v38, %v385_v36 }
 0x676   :  { %v389_v40 = vadd.f32 %v388_v39, %v272_v3  ;;  %v534_v3 = vld [vmem:[%s933_s6] ss:$0 sm:$0xff] }
 0x678   :  { %v392_v41 = vsel %vm157_vm2, %v389_v40, 0.0 }
 0x679   :  { %393 = vadd.xlane.f32.xlu0 %v392_v41 }
 0x706   :  { %v394_v42 = vpop.xlane.xlu0 %393 }
 0x707   :  { %v395_v43 = vmul.f32 0.015625, %v394_v42 }
 0x709   :  { %v396_v44 = vsub.f32 %v389_v40, %v395_v43 }
 0x70b   :  { %v397_v45 = vmul.f32 %v396_v44, %v396_v44 }
 0x70d   :  { %v398_v46 = vsel %vm157_vm2, %v397_v45, 0.0 }
 0x70e   :  { %399 = vadd.xlane.f32.xlu1 %v398_v46 }
 0x79b   :  { %v400_v59 = vpop.xlane.xlu1 %399 }
 0x79c   :  { %v401_v60 = vmul.f32 0.015625, %v400_v59 }
 0x79e   :  { %v402_v61 = vadd.f32 1e-05, %v401_v60 }
 0x7a0   :  { %697 = vrsqrt.f32 %v402_v61 }
 0x7aa   :  { %v698_v62 = vpop.eup %697 }
 0x7ab   :  { %v404_v10 = vmul.f32 %v698_v62, %v396_v44 }
 0x7ad   :  { %v409_v1 = vmul.f32 %v532_v63, %v404_v10 }
 0x7af   :  { %v414_v2 = vadd.f32 %v533_v0, %v409_v1 }
 0x7b1   :  { %634 = vmatmul.mubr.msk.f32.vlgmr.msra.gmra.mrb[2].mxu1 %vm157_vm2, %v414_v2 }
 0x884   :  { %v499_v4 = vpop.f32.mrb[2].mxu1 }
 0x885   :  { %v500_v5 = vadd.f32 %v534_v3, %v499_v4  ;;  %v635_v6 = vpop.f32.mrb[3].mxu1 }
 0x887   :  { %504 = vst.msk [vmem:[#allocation5] sm:$0xff] %vm503_vm3, %v500_v5 }
 0x888   :  { %732 = shalt.err (!%p729_p12)
}
 0x889   :  { %s733_s14 = scalar_lea.hbm %s934_s7, 128 }
 0x88a   :  { %p734_p13 = scmp.ne.s32.totalorder %s934_s7, %s733_s14  ;;  %p737_p0 = scmp.lt.u32.totalorder %s733_s14, %s934_s7 }
 0x88c   :  { %p739_p1 = pnand %p737_p0, %p734_p13 }
 0x88e   :  { %742 = shalt.err (!%p739_p1)
}
 0x88f   :  { %514 = dma.vmem_to_hbm [thread:$0]  %s512_s11, 128, %s934_s7, [#allocation4]  }
 0x890   :  { %745 = dma.done.wait [#allocation4], 128  }
 0x891   :  { %746 = vsyncadd [#allocation4], 4294967168 }
 0x892   :  { %518 = vsyncpa [#allocation3], 1 }
 0x893   :  { %519 = vsyncpa [#allocation4], 1 }

</bundles_post_ra>
